<compile_context>
chip_gen: v7x
topology: tpu7x:2x2x1
jax: 0.10.0
libtpu: 0.0.40
codegen_flags: <defaults>
</compile_context>

<pallas_src>
import functools
import math

import jax
import jax.numpy as jnp
from jax.experimental import pallas as pl
from jax.experimental.pallas import tpu as pltpu

_LOG2E = 1.4426950408889634


def _criterion_kernel(sel_ref, s1_ref, s2_ref, wl_ref, *, pack, inv_c, tao, inv_alpha):
    # Native-dtype loads: bf16 stays bf16 for the elementwise work (v6e/v7x
    # bf16 VALU/EUP paths); reductions accumulate in f32.
    s1 = s1_ref[...]
    s2 = s2_ref[...]

    if pack > 1:
        # Lane-packed layout: each W-lane row carries `pack` batch rows of
        # width C.  Per-batch-row (segment) sums run on the otherwise-idle MXU
        # via a 0/1 selector matmul with f32 accumulation.
        sel = sel_ref[...]

        def seg_sum(x):
            return jnp.dot(x, sel, preferred_element_type=jnp.float32)
    else:
        def seg_sum(x):
            return jnp.sum(x.astype(jnp.float32), axis=-1, keepdims=True)

    S1 = seg_sum(s1)                       # (tr, pack) f32 : sum(x)
    T1 = seg_sum(s1 * jnp.log(s1))         # (tr, pack) f32 : sum(x*ln x)
    S2 = seg_sum(s2)
    T2 = seg_sum(s2 * jnp.log(s2))
    D = seg_sum(jnp.abs(s1 - s2))          # (tr, pack) f32 : sum|s1-s2|

    # -sum(p*log2 p) = log2e*(ln S - T/S); fold both matrices so the per-row
    # epilogue is 1 log + 1 exact divide + 1 tanh on the EUP.
    P = S1 * S2
    Q = T1 * S2 + T2 * S1
    ent = (jnp.log(P) - Q / P) * jnp.float32(0.5 * _LOG2E)        # (tr, pack)

    loss = 1.0 - D * jnp.float32(inv_c)
    # sigmoid(z) = 0.5*(1+tanh(z/2)): one EUP op, no exp/divide, no overflow.
    w = jnp.float32(0.5 * inv_alpha) * (1.0 + jnp.tanh(0.5 * (ent - jnp.float32(tao))))
    wl_ref[...] = w * loss                                        # (tr, pack) f32


def criterion_classifier(scores1, scores2, *, tao=0.1, alpha=128.0,
                         tile_rows=None, pack_width=1024,
                         target_block_bytes=4 * 1024 * 1024,
                         vmem_limit_bytes=48 * 1024 * 1024):
    """Pallas TPU forward pass of criterion_classifier. Returns a scalar (f32)."""
    assert scores1.shape == scores2.shape and scores1.ndim == 2
    assert scores1.dtype == scores2.dtype
    B, C = scores1.shape
    dtype = scores1.dtype
    itemsize = dtype.itemsize

    # ---- lane packing plan: pack `pack` batch rows into a W = C*pack lane row.
    if C < 128:
        p0 = 128 // math.gcd(C, 128)                 # minimal valid pack
        pack = p0 * max(1, pack_width // (p0 * C))   # widen toward pack_width lanes
    else:
        pack = 1
    W = C * pack
    R = -(-B // pack)                                # packed rows needed

    # ---- batch tiling: biggest block that fits the VMEM budget.
    if tile_rows is None:
        target_rows = max(8, target_block_bytes // (W * itemsize))
        n_tiles = max(1, -(-R // target_rows))
        tile_rows_ = ((-(-R // n_tiles)) + 7) // 8 * 8   # balanced, multiple of 8
    else:
        assert tile_rows % 8 == 0, tile_rows
        tile_rows_ = tile_rows
        n_tiles = -(-R // tile_rows_)
    R_pad = n_tiles * tile_rows_
    B_pad = R_pad * pack

    # ---- pad ragged batches with 1.0 rows (log(1)=0 -> finite, masked out below).
    if B_pad != B:
        fill = jnp.ones((B_pad - B, C), dtype)
        s1p = jnp.concatenate([scores1, fill], axis=0)
        s2p = jnp.concatenate([scores2, fill], axis=0)
    else:
        s1p, s2p = scores1, scores2

    # Free row-major reshape: batch row g*pack + p lands in packed row g, segment p.
    s1r = s1p.reshape(R_pad, W)
    s2r = s2p.reshape(R_pad, W)

    # 0/1 segment-sum selector, M[l, p] = (l // C == p); resident across the grid.
    if pack > 1:
        sel = (jnp.arange(W, dtype=jnp.int32)[:, None] // C
               == jnp.arange(pack, dtype=jnp.int32)[None, :]).astype(dtype)
    else:
        sel = jnp.ones((C, 1), dtype)   # unused in the pack==1 kernel path

    kernel = functools.partial(
        _criterion_kernel,
        pack=pack,
        inv_c=1.0 / float(C),
        tao=float(tao),
        inv_alpha=1.0 / float(alpha),
    )

    wl = pl.pallas_call(
        kernel,
        out_shape=jax.ShapeDtypeStruct((R_pad, pack), jnp.float32),
        grid_spec=pltpu.PrefetchScalarGridSpec(
            num_scalar_prefetch=0,
            grid=(n_tiles,),
            in_specs=[
                pl.BlockSpec(sel.shape, lambda i: (0, 0)),        # selector (resident)
                pl.BlockSpec((tile_rows_, W), lambda i: (i, 0)),  # scores1 tile
                pl.BlockSpec((tile_rows_, W), lambda i: (i, 0)),  # scores2 tile
            ],
            out_specs=pl.BlockSpec((tile_rows_, pack), lambda i: (i, 0)),
        ),
        compiler_params=pltpu.CompilerParams(
            dimension_semantics=("parallel",),      # megacore sharding on v7x
            vmem_limit_bytes=int(vmem_limit_bytes),
        ),
    )(sel, s1r, s2r)

    # wl[g, p] is batch row g*pack + p; drop padded rows, tiny final reduction.
    return jnp.mean(wl.reshape(-1)[:B])


def _reference(scores1, scores2, tao=0.1, alpha=128.0):
    s1 = scores1.astype(jnp.float32)
    s2 = scores2.astype(jnp.float32)
    p1 = s1 / jnp.sum(s1, axis=1, keepdims=True)
    p2 = s2 / jnp.sum(s2, axis=1, keepdims=True)
    ent = -jnp.sum(p1 * jnp.log2(p1) + p2 * jnp.log2(p2), axis=1) / 2
    loss = 1.0 - jnp.mean(jnp.abs(s1 - s2), axis=1)
    w = jax.nn.sigmoid(ent - tao) / alpha
    return jnp.mean(w * loss)


if __name__ == "__main__":
    key = jax.random.PRNGKey(0)
    k1, k2, k3, k4, k5, k6 = jax.random.split(key, 6)

    # Test 1: small f32 problem (batch=8, classes=32) -> wide lane packing
    # (pack=32, W=1024), single grid step, batch padded to the block size.
    # Scores strictly positive (score==0 is NaN in the PyTorch reference too).
    B, C = 8, 32
    s1 = jax.random.uniform(k1, (B, C), jnp.float32, minval=0.1, maxval=1.0)
    s2 = jax.random.uniform(k2, (B, C), jnp.float32, minval=0.1, maxval=1.0)
    out = criterion_classifier(s1, s2)
    jax.block_until_ready(out)
    ref = _reference(s1, s2)
    assert out.shape == ()
    # rtol covers possible reduced-precision MXU passes for f32 segment sums.
    assert jnp.allclose(out, ref, rtol=1e-3, atol=1e-6), (out, ref)

    # Test 2: native bf16 inputs, packed path (pack=4, W=128), multi-step
    # "parallel" grid (tile_rows=8 -> 4 steps), no padding needed.
    B2, C2 = 128, 32
    a = jax.random.uniform(k3, (B2, C2), jnp.float32, minval=0.1, maxval=1.0)
    b = jax.random.uniform(k4, (B2, C2), jnp.float32, minval=0.1, maxval=1.0)
    a_bf16, b_bf16 = a.astype(jnp.bfloat16), b.astype(jnp.bfloat16)
    out2 = criterion_classifier(a_bf16, b_bf16, tile_rows=8, pack_width=128)
    jax.block_until_ready(out2)
    ref2 = _reference(a_bf16, b_bf16)
    assert jnp.allclose(out2, ref2, rtol=5e-3, atol=1e-5), (out2, ref2)

    # Test 3: un-packable class count (C=160 >= 128 -> pack=1 path) with a
    # ragged batch (B=50 -> padded to 56) exercising the padding/masking path.
    B3, C3 = 50, 160
    c = jax.random.uniform(k5, (B3, C3), jnp.float32, minval=0.1, maxval=1.0)
    d = jax.random.uniform(k6, (B3, C3), jnp.float32, minval=0.1, maxval=1.0)
    out3 = criterion_classifier(c, d)
    jax.block_until_ready(out3)
    ref3 = _reference(c, d)
    assert jnp.allclose(out3, ref3, rtol=1e-4, atol=1e-6), (out3, ref3)

    print("KERNEL_OK")
</pallas_src>

<mosaic_0001>
module attributes {stable_mosaic.version = 11 : i64} {
  func.func @_criterion_kernel(%arg0: i32, %arg1: memref<1024x32xf32, #tpu.memory_space<vmem>>, %arg2: memref<8x1024xf32, #tpu.memory_space<vmem>>, %arg3: memref<8x1024xf32, #tpu.memory_space<vmem>>, %arg4: memref<8x32xf32, #tpu.memory_space<vmem>>) attributes {dimension_semantics = [#tpu.dimension_semantics<parallel>], iteration_bounds = array<i64: 1>, scalar_prefetch = 0 : i64, scratch_operands = 0 : i64, tpu.core_type = #tpu.core_type<tc>, window_params = [{pipeline_mode = #tpu.pipeline_mode<synchronous>, transform_indices = @transform_0, window_bounds = array<i64: 1024, 32>}, {transform_indices = @transform_1, window_bounds = array<i64: 8, 1024>}, {transform_indices = @transform_2, window_bounds = array<i64: 8, 1024>}, {transform_indices = @transform_3, window_bounds = array<i64: 8, 32>}]} {
    %c0 = arith.constant 0 : index
    %c0_0 = arith.constant 0 : index
    %0 = vector.load %arg2[%c0, %c0_0] : memref<8x1024xf32, #tpu.memory_space<vmem>>, vector<8x1024xf32>
    %c0_1 = arith.constant 0 : index
    %c0_2 = arith.constant 0 : index
    %1 = vector.load %arg3[%c0_1, %c0_2] : memref<8x1024xf32, #tpu.memory_space<vmem>>, vector<8x1024xf32>
    %c0_3 = arith.constant 0 : index
    %c0_4 = arith.constant 0 : index
    %2 = vector.load %arg1[%c0_3, %c0_4] : memref<1024x32xf32, #tpu.memory_space<vmem>>, vector<1024x32xf32>
    %cst = arith.constant dense<0.000000e+00> : vector<8x32xf32>
    %3 = tpu.matmul %0, %2, %cst {dimension_numbers = #tpu.dot_dimension_numbers<[1], [0], [0], [1], [0, 0, 1, 1], [], []>} : vector<8x1024xf32>, vector<1024x32xf32>, vector<8x32xf32> -> vector<8x32xf32>
    %4 = math.log %0 : vector<8x1024xf32>
    %5 = arith.mulf %0, %4 : vector<8x1024xf32>
    %cst_5 = arith.constant dense<0.000000e+00> : vector<8x32xf32>
    %6 = tpu.matmul %5, %2, %cst_5 {dimension_numbers = #tpu.dot_dimension_numbers<[1], [0], [0], [1], [0, 0, 1, 1], [], []>} : vector<8x1024xf32>, vector<1024x32xf32>, vector<8x32xf32> -> vector<8x32xf32>
    %cst_6 = arith.constant dense<0.000000e+00> : vector<8x32xf32>
    %7 = tpu.matmul %1, %2, %cst_6 {dimension_numbers = #tpu.dot_dimension_numbers<[1], [0], [0], [1], [0, 0, 1, 1], [], []>} : vector<8x1024xf32>, vector<1024x32xf32>, vector<8x32xf32> -> vector<8x32xf32>
    %8 = math.log %1 : vector<8x1024xf32>
    %9 = arith.mulf %1, %8 : vector<8x1024xf32>
    %cst_7 = arith.constant dense<0.000000e+00> : vector<8x32xf32>
    %10 = tpu.matmul %9, %2, %cst_7 {dimension_numbers = #tpu.dot_dimension_numbers<[1], [0], [0], [1], [0, 0, 1, 1], [], []>} : vector<8x1024xf32>, vector<1024x32xf32>, vector<8x32xf32> -> vector<8x32xf32>
    %11 = arith.subf %0, %1 : vector<8x1024xf32>
    %12 = math.absf %11 : vector<8x1024xf32>
    %cst_8 = arith.constant dense<0.000000e+00> : vector<8x32xf32>
    %13 = tpu.matmul %12, %2, %cst_8 {dimension_numbers = #tpu.dot_dimension_numbers<[1], [0], [0], [1], [0, 0, 1, 1], [], []>} : vector<8x1024xf32>, vector<1024x32xf32>, vector<8x32xf32> -> vector<8x32xf32>
    %14 = arith.mulf %3, %7 : vector<8x32xf32>
    %15 = arith.mulf %6, %7 : vector<8x32xf32>
    %16 = arith.mulf %10, %3 : vector<8x32xf32>
    %17 = arith.addf %15, %16 : vector<8x32xf32>
    %18 = math.log %14 : vector<8x32xf32>
    %19 = arith.divf %17, %14 : vector<8x32xf32>
    %20 = arith.subf %18, %19 : vector<8x32xf32>
    %cst_9 = arith.constant 0.72134751 : f32
    %21 = vector.broadcast %cst_9 : f32 to vector<8x32xf32>
    %22 = arith.mulf %20, %21 : vector<8x32xf32>
    %cst_10 = arith.constant 3.125000e-02 : f32
    %23 = vector.broadcast %cst_10 : f32 to vector<8x32xf32>
    %24 = arith.mulf %13, %23 : vector<8x32xf32>
    %cst_11 = arith.constant 1.000000e+00 : f32
    %25 = vector.broadcast %cst_11 : f32 to vector<8x32xf32>
    %26 = arith.subf %25, %24 : vector<8x32xf32>
    %cst_12 = arith.constant 1.000000e-01 : f32
    %27 = vector.broadcast %cst_12 : f32 to vector<8x32xf32>
    %28 = arith.subf %22, %27 : vector<8x32xf32>
    %cst_13 = arith.constant 5.000000e-01 : f32
    %29 = vector.broadcast %cst_13 : f32 to vector<8x32xf32>
    %30 = arith.mulf %29, %28 : vector<8x32xf32>
    %31 = math.tanh %30 : vector<8x32xf32>
    %cst_14 = arith.constant 1.000000e+00 : f32
    %32 = vector.broadcast %cst_14 : f32 to vector<8x32xf32>
    %33 = arith.addf %32, %31 : vector<8x32xf32>
    %cst_15 = arith.constant 3.906250e-03 : f32
    %34 = vector.broadcast %cst_15 : f32 to vector<8x32xf32>
    %35 = arith.mulf %34, %33 : vector<8x32xf32>
    %36 = arith.mulf %35, %26 : vector<8x32xf32>
    %c0_16 = arith.constant 0 : index
    %c0_17 = arith.constant 0 : index
    %37 = vector.load %arg4[%c0_16, %c0_17] : memref<8x32xf32, #tpu.memory_space<vmem>>, vector<8x32xf32>
    tpu.vector_store %arg4[%c0_16, %c0_17], %36 {strides = array<i32>} : memref<8x32xf32, #tpu.memory_space<vmem>>, vector<8x32xf32>,
    return
  }
  func.func @transform_0(%arg0: i32) -> (i32, i32) {
    %c0_i32 = arith.constant 0 : i32
    %c0_i32_0 = arith.constant 0 : i32
    %c0_i32_1 = arith.constant 0 : i32
    return %c0_i32, %c0_i32_0 : i32, i32
  }
  func.func @transform_1(%arg0: i32) -> (i32, i32) {
    %c0_i32 = arith.constant 0 : i32
    %c0_i32_0 = arith.constant 0 : i32
    return %arg0, %c0_i32 : i32, i32
  }
  func.func @transform_2(%arg0: i32) -> (i32, i32) {
    %c0_i32 = arith.constant 0 : i32
    %c0_i32_0 = arith.constant 0 : i32
    return %arg0, %c0_i32 : i32, i32
  }
  func.func @transform_3(%arg0: i32) -> (i32, i32) {
    %c0_i32 = arith.constant 0 : i32
    %c0_i32_0 = arith.constant 0 : i32
    return %arg0, %c0_i32 : i32, i32
  }
}

</mosaic_0001>

<bundles_post_ra>
// kernel: tpu_custom_call.1
= control target key start
LH: loop header
LB: loop body
LE: loop exit
PB: predicated region body
PF: predicated region fallthrough
CT: control target
= control target key end

     0   :  { %s4074_s0 = inlined_call_operand.vmem [shape: f32[1024,32], index: 0, kind: input, shape index: {}]   ;;  %s4075_s1 = inlined_call_operand.vmem [shape: f32[8,1024], index: 1, kind: input, shape index: {}]   ;;  %s4076_s2 = inlined_call_operand.vmem [shape: f32[8,1024], index: 2, kind: input, shape index: {}]   ;;  %s4077_s3 = inlined_call_operand.hbm [shape: f32[8,32], index: 3, kind: output, shape index: {}]  }
   0x1   :  { %v47_v0 = vld [vmem:[%s4074_s0 + $0x80] sm:$0xff]  ;;  %v48_v1 = vld [vmem:[%s4074_s0 + $0x88] sm:$0xff]  ;;  %v49_v11 = vld [vmem:[%s4074_s0 + $0x90] sm:$0xff] }
   0x2   :  { %v79_v2 = vld [vmem:[%s4074_s0 + $0x180] sm:$0xff]  ;;  %v3091_v3 = vpack.c.bf16 %v48_v1, %v47_v0  ;;  %v80_v4 = vld [vmem:[%s4074_s0 + $0x188] sm:$0xff]  ;;  %v50_v13 = vld [vmem:[%s4074_s0 + $0x98] sm:$0xff] }
   0x3   :  { %v31_v5 = vld [vmem:[%s4074_s0] sm:$0xff]  ;;  %v32_v6 = vld [vmem:[%s4074_s0 + $0x8] sm:$0xff]  ;;  %v3102_v7 = vpack.c.bf16 %v80_v4, %v79_v2  ;;  %v81_v14 = vld [vmem:[%s4074_s0 + $0x190] sm:$0xff]  ;;  %v3129_v16 = vpack.c.bf16 %v50_v13, %v49_v11 }
   0x4   :  { %v3104_v8 = vpack.c.bf16 %v32_v6, %v31_v5  ;;  %v63_v9 = vld [vmem:[%s4074_s0 + $0x100] sm:$0xff]  ;;  %v64_v10 = vld [vmem:[%s4074_s0 + $0x108] sm:$0xff]  ;;  %2359 = vmatprep.subr.bf16.mxu0 %v3091_v3  ;;  %v82_v15 = vld [vmem:[%s4074_s0 + $0x198] sm:$0xff] }
   0x5   :  { %v3116_v12 = vpack.c.bf16 %v64_v10, %v63_v9  ;;  %2391 = vmatprep.subr.bf16.mxu1 %v3102_v7  ;;  %v3131_v17 = vpack.c.bf16 %v82_v15, %v81_v14  ;;  %v33_v18 = vld [vmem:[%s4074_s0 + $0x10] sm:$0xff]  ;;  %v34_v19 = vld [vmem:[%s4074_s0 + $0x18] sm:$0xff]  ;;  %v51_v23 = vld [vmem:[%s4074_s0 + $0xa0] sm:$0xff] }
   0x6   :  { %2361 = vmatpush3.bf16.msra.mxu0 %v3104_v8  ;;  %v65_v20 = vld [vmem:[%s4074_s0 + $0x110] sm:$0xff]  ;;  %v3143_v21 = vpack.c.bf16 %v34_v19, %v33_v18  ;;  %v66_v22 = vld [vmem:[%s4074_s0 + $0x118] sm:$0xff]  ;;  %v52_v24 = vld [vmem:[%s4074_s0 + $0xa8] sm:$0xff] }
   0x7   :  { %2393 = vmatpush3.bf16.msra.mxu1 %v3116_v12  ;;  %2363 = vmatprep.subr.bf16.mxu0 %v3129_v16  ;;  %v3156_v25 = vpack.c.bf16 %v66_v22, %v65_v20  ;;  %v3158_v26 = vpack.c.bf16 %v52_v24, %v51_v23  ;;  %v83_v27 = vld [vmem:[%s4074_s0 + $0x1a0] sm:$0xff]  ;;  %v84_v28 = vld [vmem:[%s4074_s0 + $0x1a8] sm:$0xff]  ;;  %v53_v35 = vld [vmem:[%s4074_s0 + $0xb0] sm:$0xff] }
   0x8   :  { %2395 = vmatprep.subr.bf16.mxu1 %v3131_v17  ;;  %v35_v29 = vld [vmem:[%s4074_s0 + $0x20] sm:$0xff]  ;;  %v3169_v30 = vpack.c.bf16 %v84_v28, %v83_v27  ;;  %v36_v31 = vld [vmem:[%s4074_s0 + $0x28] sm:$0xff]  ;;  %v54_v36 = vld [vmem:[%s4074_s0 + $0xb8] sm:$0xff] }
   0x9   :  { %v67_v32 = vld [vmem:[%s4074_s0 + $0x120] sm:$0xff]  ;;  %v68_v33 = vld [vmem:[%s4074_s0 + $0x128] sm:$0xff]  ;;  %v3181_v34 = vpack.c.bf16 %v36_v31, %v35_v29  ;;  %v85_v37 = vld [vmem:[%s4074_s0 + $0x1b0] sm:$0xff]  ;;  %v3196_v39 = vpack.c.bf16 %v54_v36, %v53_v35 }
   0xa   :  { %2365 = vmatpush3.bf16.msra.mxu0 %v3143_v21  ;;  %v3194_v38 = vpack.c.bf16 %v68_v33, %v67_v32  ;;  %v86_v40 = vld [vmem:[%s4074_s0 + $0x1b8] sm:$0xff]  ;;  %v37_v41 = vld [vmem:[%s4074_s0 + $0x30] sm:$0xff]  ;;  %v55_v46 = vld [vmem:[%s4074_s0 + $0xc0] sm:$0xff] }
   0xb   :  { %2397 = vmatpush3.bf16.msra.mxu1 %v3156_v25  ;;  %2367 = vmatprep.subr.bf16.mxu0 %v3158_v26  ;;  %v38_v42 = vld [vmem:[%s4074_s0 + $0x38] sm:$0xff]  ;;  %v3208_v43 = vpack.c.bf16 %v86_v40, %v85_v37  ;;  %v69_v44 = vld [vmem:[%s4074_s0 + $0x130] sm:$0xff]  ;;  %v56_v47 = vld [vmem:[%s4074_s0 + $0xc8] sm:$0xff] }
   0xc   :  { %2399 = vmatprep.subr.bf16.mxu1 %v3169_v30  ;;  %v70_v45 = vld [vmem:[%s4074_s0 + $0x138] sm:$0xff]  ;;  %v87_v48 = vld [vmem:[%s4074_s0 + $0x1c0] sm:$0xff]  ;;  %v88_v49 = vld [vmem:[%s4074_s0 + $0x1c8] sm:$0xff]  ;;  %v3229_v50 = vpack.c.bf16 %v38_v42, %v37_v41  ;;  %v3235_v52 = vpack.c.bf16 %v56_v47, %v55_v46 }
   0xd   :  { %v3233_v51 = vpack.c.bf16 %v70_v45, %v69_v44  ;;  %v39_v53 = vld [vmem:[%s4074_s0 + $0x40] sm:$0xff]  ;;  %v40_v54 = vld [vmem:[%s4074_s0 + $0x48] sm:$0xff]  ;;  %v3247_v56 = vpack.c.bf16 %v88_v49, %v87_v48  ;;  %v57_v58 = vld [vmem:[%s4074_s0 + $0xd0] sm:$0xff] }
   0xe   :  { %2369 = vmatpush3.bf16.msra.mxu0 %v3181_v34  ;;  %v71_v55 = vld [vmem:[%s4074_s0 + $0x140] sm:$0xff]  ;;  %v72_v57 = vld [vmem:[%s4074_s0 + $0x148] sm:$0xff]  ;;  %v58_v59 = vld [vmem:[%s4074_s0 + $0xd8] sm:$0xff]  ;;  %v3265_v62 = vpack.c.bf16 %v40_v54, %v39_v53 }
   0xf   :  { %2401 = vmatpush3.bf16.msra.mxu1 %v3194_v38  ;;  %2371 = vmatprep.subr.bf16.mxu0 %v3196_v39  ;;  %4144 = vst [vmem:[#allocation5_spill] sm:$0xff] %v3247_v56  ;;  %v89_v60 = vld [vmem:[%s4074_s0 + $0x1d0] sm:$0xff]  ;;  %v90_v61 = vld [vmem:[%s4074_s0 + $0x1d8] sm:$0xff]  ;;  %v3269_v63 = vpack.c.bf16 %v72_v57, %v71_v55  ;;  %v3271_v0 = vpack.c.bf16 %v58_v59, %v57_v58  ;;  %v59_v9 = vld [vmem:[%s4074_s0 + $0xe0] sm:$0xff] }
  0x10   :  { %2403 = vmatprep.subr.bf16.mxu1 %v3208_v43  ;;  %v41_v1 = vld [vmem:[%s4074_s0 + $0x50] sm:$0xff]  ;;  %v42_v2 = vld [vmem:[%s4074_s0 + $0x58] sm:$0xff]  ;;  %v3283_v5 = vpack.c.bf16 %v90_v61, %v89_v60  ;;  %v60_v10 = vld [vmem:[%s4074_s0 + $0xe8] sm:$0xff] }
  0x11   :  { %4145 = vst [vmem:[#allocation6_spill] sm:$0xff] %v3269_v63  ;;  %v73_v4 = vld [vmem:[%s4074_s0 + $0x150] sm:$0xff]  ;;  %v74_v6 = vld [vmem:[%s4074_s0 + $0x158] sm:$0xff]  ;;  %v91_v11 = vld [vmem:[%s4074_s0 + $0x1e0] sm:$0xff]  ;;  %v3301_v14 = vpack.c.bf16 %v42_v2, %v41_v1  ;;  %v3313_v20 = vpack.c.bf16 %v60_v10, %v59_v9 }
  0x12   :  { %2373 = vmatpush3.bf16.msra.mxu0 %v3229_v50  ;;  %4146 = vst [vmem:[#allocation7_spill] sm:$0xff] %v3283_v5  ;;  %v92_v13 = vld [vmem:[%s4074_s0 + $0x1e8] sm:$0xff]  ;;  %v43_v15 = vld [vmem:[%s4074_s0 + $0x60] sm:$0xff]  ;;  %v3311_v19 = vpack.c.bf16 %v74_v6, %v73_v4  ;;  %v3326_v24 = vld [vmem:[%s4075_s1 + $0x18] sm:$0xff] }
  0x13   :  { %2405 = vmatpush3.bf16.msra.mxu1 %v3233_v51  ;;  %2375 = vmatprep.subr.bf16.mxu0 %v3235_v52  ;;  %4147 = vst [vmem:[#allocation8_spill] sm:$0xff] %v3301_v14  ;;  %v44_v18 = vld [vmem:[%s4074_s0 + $0x68] sm:$0xff]  ;;  %v75_v22 = vld [vmem:[%s4074_s0 + $0x160] sm:$0xff]  ;;  %4150 = vst [vmem:[#allocation11_spill] sm:$0xff] %v3326_v24  ;;  %v3329_v27 = vpack.c.bf16 %v92_v13, %v91_v11 }
  0x14   :  { %2407 = vmatprep.subr.bf16.mxu1 %v3247_v56  ;;  %4148 = vst [vmem:[#allocation9_spill] sm:$0xff] %v3311_v19  ;;  %v3321_v23 = vld [vmem:[%s4075_s1 + $0x8] sm:$0xff]  ;;  %v61_v29 = vld [vmem:[%s4074_s0 + $0xf0] sm:$0xff]  ;;  %v62_v31 = vld [vmem:[%s4074_s0 + $0xf8] sm:$0xff]  ;;  %293 = vmatprep.mubr.f32.mxu1 %v3326_v24  ;;  %v3349_v35 = vpack.c.bf16 %v44_v18, %v43_v15 }
  0x15   :  { %4149 = vst [vmem:[#allocation10_spill] sm:$0xff] %v3321_v23  ;;  %4151 = vst [vmem:[#allocation12_spill] sm:$0xff] %v3329_v27  ;;  %v76_v28 = vld [vmem:[%s4074_s0 + $0x168] sm:$0xff]  ;;  %223 = vmatprep.mubr.f32.mxu0 %v3321_v23  ;;  %v93_v32 = vld [vmem:[%s4074_s0 + $0x1f0] sm:$0xff]  ;;  %v3355_v37 = vpack.c.bf16 %v62_v31, %v61_v29 }
  0x16   :  { %2377 = vmatpush3.bf16.msra.mxu0 %v3265_v62  ;;  %v94_v33 = vld [vmem:[%s4074_s0 + $0x1f8] sm:$0xff]  ;;  %v3353_v36 = vpack.c.bf16 %v76_v28, %v75_v22  ;;  %v45_v40 = vld [vmem:[%s4074_s0 + $0x70] sm:$0xff]  ;;  %v111_v46 = vld [vmem:[%s4074_s0 + $0x280] sm:$0xff] }
  0x17   :  { %2409 = vmatpush3.bf16.msra.mxu1 %v3269_v63  ;;  %2379 = vmatprep.subr.bf16.mxu0 %v3271_v0  ;;  %v46_v41 = vld [vmem:[%s4074_s0 + $0x78] sm:$0xff]  ;;  %v77_v42 = vld [vmem:[%s4074_s0 + $0x170] sm:$0xff]  ;;  %v3367_v44 = vpack.c.bf16 %v94_v33, %v93_v32  ;;  %v112_v47 = vld [vmem:[%s4074_s0 + $0x288] sm:$0xff] }
  0x18   :  { %2411 = vmatprep.subr.bf16.mxu1 %v3283_v5  ;;  %v78_v45 = vld [vmem:[%s4074_s0 + $0x178] sm:$0xff]  ;;  %v143_v48 = vld [vmem:[%s4074_s0 + $0x380] sm:$0xff]  ;;  %v144_v49 = vld [vmem:[%s4074_s0 + $0x388] sm:$0xff]  ;;  %v3385_v53 = vpack.c.bf16 %v46_v41, %v45_v40  ;;  %v3391_v55 = vpack.c.bf16 %v112_v47, %v111_v46 }
  0x19   :  { %v3389_v54 = vpack.c.bf16 %v78_v45, %v77_v42  ;;  %v95_v57 = vld [vmem:[%s4074_s0 + $0x200] sm:$0xff]  ;;  %v96_v58 = vld [vmem:[%s4074_s0 + $0x208] sm:$0xff]  ;;  %v3403_v60 = vpack.c.bf16 %v144_v49, %v143_v48  ;;  %v113_v1 = vld [vmem:[%s4074_s0 + $0x290] sm:$0xff] }
  0x1a   :  { %2381 = vmatpush3.bf16.msra.mxu0 %v3301_v14  ;;  %v127_v59 = vld [vmem:[%s4074_s0 + $0x300] sm:$0xff]  ;;  %v128_v61 = vld [vmem:[%s4074_s0 + $0x308] sm:$0xff]  ;;  %v114_v2 = vld [vmem:[%s4074_s0 + $0x298] sm:$0xff]  ;;  %v3431_v11 = vpack.c.bf16 %v96_v58, %v95_v57 }
  0x1b   :  { %2413 = vmatpush3.bf16.msra.mxu1 %v3311_v19  ;;  %2383 = vmatprep.subr.bf16.mxu0 %v3313_v20  ;;  %v145_v4 = vld [vmem:[%s4074_s0 + $0x390] sm:$0xff]  ;;  %v146_v6 = vld [vmem:[%s4074_s0 + $0x398] sm:$0xff]  ;;  %v3424_v9 = vld [vmem:[%s4075_s1] sm:$0xff]  ;;  %v3435_v13 = vpack.c.bf16 %v128_v61, %v127_v59  ;;  %v3437_v15 = vpack.c.bf16 %v114_v2, %v113_v1 }
  0x1c   :  { %2415 = vmatprep.subr.bf16.mxu1 %v3329_v27  ;;  %4152 = vst [vmem:[#allocation13_spill] sm:$0xff] %v3424_v9  ;;  %v3429_v10 = vld [vmem:[%s4075_s1 + $0x10] sm:$0xff]  ;;  %v98_v22 = vld [vmem:[%s4074_s0 + $0x218] sm:$0xff]  ;;  %v3449_v29 = vpack.c.bf16 %v146_v6, %v145_v4  ;;  %v115_v32 = vld [vmem:[%s4074_s0 + $0x2a0] sm:$0xff] }
  0x1d   :  { %4153 = vst [vmem:[#allocation14_spill] sm:$0xff] %v3429_v10  ;;  %4154 = vst [vmem:[#allocation15_spill] sm:$0xff] %v3437_v15  ;;  %v97_v18 = vld [vmem:[%s4074_s0 + $0x210] sm:$0xff]  ;;  %v130_v31 = vld [vmem:[%s4074_s0 + $0x318] sm:$0xff] }
  0x1e   :  { %2385 = vmatpush3.bf16.msra.mxu0 %v3349_v35  ;;  %v129_v28 = vld [vmem:[%s4074_s0 + $0x310] sm:$0xff]  ;;  %4155 = vst [vmem:[#allocation16_spill] sm:$0xff] %v3449_v29  ;;  %v116_v33 = vld [vmem:[%s4074_s0 + $0x2a8] sm:$0xff]  ;;  %v147_v40 = vld [vmem:[%s4074_s0 + $0x3a0] sm:$0xff]  ;;  %v3469_v42 = vpack.c.bf16 %v98_v22, %v97_v18 }
  0x1f   :  { %2417 = vmatpush3.bf16.msra.mxu1 %v3353_v36  ;;  %2387 = vmatprep.subr.bf16.mxu0 %v3355_v37  ;;  %v148_v41 = vld [vmem:[%s4074_s0 + $0x3a8] sm:$0xff]  ;;  %v3473_v45 = vpack.c.bf16 %v130_v31, %v129_v28  ;;  %v3475_v46 = vpack.c.bf16 %v116_v33, %v115_v32  ;;  %v99_v47 = vld [vmem:[%s4074_s0 + $0x220] sm:$0xff]  ;;  %v117_v59 = vld [vmem:[%s4074_s0 + $0x2b0] sm:$0xff] }
  0x20   :  { %2419 = vmatprep.subr.bf16.mxu1 %v3367_v44  ;;  %4156 = vst [vmem:[#allocation17_spill] sm:$0xff] %v3469_v42  ;;  %v100_v48 = vld [vmem:[%s4074_s0 + $0x228] sm:$0xff]  ;;  %v131_v49 = vld [vmem:[%s4074_s0 + $0x320] sm:$0xff]  ;;  %v3487_v57 = vpack.c.bf16 %v148_v41, %v147_v40  ;;  %v118_v61 = vld [vmem:[%s4074_s0 + $0x2b8] sm:$0xff] }
  0x21   :  { %v132_v58 = vld [vmem:[%s4074_s0 + $0x328] sm:$0xff]  ;;  %v149_v1 = vld [vmem:[%s4074_s0 + $0x3b0] sm:$0xff]  ;;  %v150_v2 = vld [vmem:[%s4074_s0 + $0x3b8] sm:$0xff]  ;;  %v3505_v4 = vpack.c.bf16 %v100_v48, %v99_v47  ;;  %v3511_v18 = vpack.c.bf16 %v118_v61, %v117_v59 }
  0x22   :  { %2389 = vmatpush3.bf16.msra.mxu0 %v3385_v53  ;;  %4157 = vst [vmem:[#allocation18_spill] sm:$0xff] %v3487_v57  ;;  %v3509_v6 = vpack.c.bf16 %v132_v58, %v131_v49  ;;  %v101_v22 = vld [vmem:[%s4074_s0 + $0x230] sm:$0xff]  ;;  %v102_v28 = vld [vmem:[%s4074_s0 + $0x238] sm:$0xff]  ;;  %v3523_v32 = vpack.c.bf16 %v150_v2, %v149_v1  ;;  %v119_v40 = vld [vmem:[%s4074_s0 + $0x2c0] sm:$0xff] }
  0x23   :  { %2421 = vmatpush3.bf16.msra.mxu1 %v3389_v54  ;;  %2423 = vmatprep.subr.bf16.mxu0 %v3391_v55  ;;  %4158 = vst [vmem:[#allocation19_spill] sm:$0xff] %v3505_v4  ;;  %4160 = vst [vmem:[#allocation21_spill] sm:$0xff] %v3511_v18  ;;  %v133_v31 = vld [vmem:[%s4074_s0 + $0x330] sm:$0xff]  ;;  %v134_v33 = vld [vmem:[%s4074_s0 + $0x338] sm:$0xff]  ;;  %v3541_v49 = vpack.c.bf16 %v102_v28, %v101_v22 }
  0x24   :  { %2455 = vmatprep.subr.bf16.mxu1 %v3403_v60  ;;  %4159 = vst [vmem:[#allocation20_spill] sm:$0xff] %v3509_v6  ;;  %4161 = vst [vmem:[#allocation22_spill] sm:$0xff] %v3523_v32  ;;  %v120_v41 = vld [vmem:[%s4074_s0 + $0x2c8] sm:$0xff]  ;;  %v151_v47 = vld [vmem:[%s4074_s0 + $0x3c0] sm:$0xff]  ;;  %v3558_v1 = vpack.c.bf16 %v134_v33, %v133_v31 }
  0x25   :  { %224 = vmatmul.mubr.f32.vlgmr.msra.gmra.mrb[0].mxu0 %v3424_v9  ;;  %v152_v48 = vld [vmem:[%s4074_s0 + $0x3c8] sm:$0xff]  ;;  %4162 = vst [vmem:[#allocation23_spill] sm:$0xff] %v3541_v49  ;;  %v103_v58 = vld [vmem:[%s4074_s0 + $0x240] sm:$0xff]  ;;  %v3554_v61 = vld [vmem:[%s4075_s1 + $0x38] sm:$0xff]  ;;  %v3560_v2 = vpack.c.bf16 %v120_v41, %v119_v40 }
  0x26   :  { %294 = vmatmul.mubr.f32.vlgmr.msra.gmra.mrb[0].mxu1 %v3429_v10  ;;  %2425 = vmatpush3.bf16.msra.mxu0 %v3431_v11  ;;  %v3549_v59 = vld [vmem:[%s4075_s1 + $0x28] sm:$0xff]  ;;  %4164 = vst [vmem:[#allocation25_spill] sm:$0xff] %v3554_v61  ;;  %4165 = vst [vmem:[#allocation26_spill] sm:$0xff] %v3558_v1  ;;  %v135_v28 = vld [vmem:[%s4074_s0 + $0x340] sm:$0xff] }
  0x27   :  { %2457 = vmatpush3.bf16.msra.mxu1 %v3435_v13  ;;  %2427 = vmatprep.subr.bf16.mxu0 %v3437_v15  ;;  %4163 = vst [vmem:[#allocation24_spill] sm:$0xff] %v3549_v59  ;;  %4166 = vst [vmem:[#allocation27_spill] sm:$0xff] %v3560_v2  ;;  %v104_v22 = vld [vmem:[%s4074_s0 + $0x248] sm:$0xff]  ;;  %v121_v31 = vld [vmem:[%s4074_s0 + $0x2d0] sm:$0xff] }
  0x28   :  { %2459 = vmatprep.subr.bf16.mxu1 %v3449_v29  ;;  %v122_v33 = vld [vmem:[%s4074_s0 + $0x2d8] sm:$0xff]  ;;  %363 = vmatprep.mubr.f32.mxu0 %v3549_v59 }
  0x2a   :  { %2429 = vmatpush3.bf16.msra.mxu0 %v3469_v42 }
  0x2b   :  { %2461 = vmatpush3.bf16.msra.mxu1 %v3473_v45  ;;  %2431 = vmatprep.subr.bf16.mxu0 %v3475_v46 }
  0x2c   :  { %2463 = vmatprep.subr.bf16.mxu1 %v3487_v57 }
  0x2e   :  { %2433 = vmatpush3.bf16.msra.mxu0 %v3505_v4  ;;  %v136_v4 = vld [vmem:[%s4074_s0 + $0x348] sm:$0xff] }
  0x2f   :  { %2465 = vmatpush3.bf16.msra.mxu1 %v3509_v6  ;;  %2435 = vmatprep.subr.bf16.mxu0 %v3511_v18  ;;  %v3572_v6 = vpack.c.bf16 %v152_v48, %v151_v47 }
  0x30   :  { %2467 = vmatprep.subr.bf16.mxu1 %v3523_v32 }
  0x31   :  { %4167 = vst [vmem:[#allocation28_spill] sm:$0xff] %v3572_v6 }
  0x32   :  { %8 = vsyncpa [#allocation3], 0  ;;  %v153_v40 = vld [vmem:[%s4074_s0 + $0x3d0] sm:$0xff]  ;;  %v154_v41 = vld [vmem:[%s4074_s0 + $0x3d8] sm:$0xff]  ;;  %433 = vmatprep.mubr.f32.mxu1 %v3554_v61  ;;  %2437 = vmatpush3.bf16.msra.mxu0 %v3541_v49  ;;  %v3589_v47 = vpack.c.bf16 %v104_v22, %v103_v58  ;;  %2999 = vlog2.f32 %v3321_v23  ;;  %v3594_v48 = vpack.c.bf16 %v136_v4, %v135_v28  ;;  %v3596_v32 = vpack.c.bf16 %v122_v33, %v121_v31 }
  0x33   :  { %2469 = vmatpush3.bf16.msra.mxu1 %v3558_v1  ;;  %2439 = vmatprep.subr.bf16.mxu0 %v3560_v2  ;;  %v105_v18 = vld [vmem:[%s4074_s0 + $0x250] sm:$0xff]  ;;  %v106_v49 = vld [vmem:[%s4074_s0 + $0x258] sm:$0xff]  ;;  %3001 = vlog2.f32 %v3326_v24  ;;  %v3609_v4 = vpack.c.bf16 %v154_v41, %v153_v40  ;;  %v123_v28 = vld [vmem:[%s4074_s0 + $0x2e0] sm:$0xff]  ;;  %vm1641_vm0 = vcmask 261120  }
  0x34   :  { %4168 = vst [vmem:[#allocation29_spill] sm:$0xff] %v3589_v47  ;;  %4169 = vst [vmem:[#allocation30_spill] sm:$0xff] %v3594_v48  ;;  %v137_v58 = vld [vmem:[%s4074_s0 + $0x350] sm:$0xff]  ;;  %2471 = vmatprep.subr.bf16.mxu1 %v3572_v6  ;;  %v138_v22 = vld [vmem:[%s4074_s0 + $0x358] sm:$0xff]  ;;  %v3627_v41 = vpack.c.bf16 %v106_v49, %v105_v18  ;;  %3003 = vlog2.f32 %v3424_v9 }
  0x35   :  { %4170 = vst [vmem:[#allocation31_spill] sm:$0xff] %v3596_v32  ;;  %4171 = vst [vmem:[#allocation32_spill] sm:$0xff] %v3609_v4  ;;  %v124_v31 = vld [vmem:[%s4074_s0 + $0x2e8] sm:$0xff]  ;;  %v155_v33 = vld [vmem:[%s4074_s0 + $0x3e0] sm:$0xff]  ;;  %v3631_v6 = vpack.c.bf16 %v138_v22, %v137_v58  ;;  %3005 = vlog2.f32 %v3429_v10 }
  0x36   :  { %v156_v40 = vld [vmem:[%s4074_s0 + $0x3e8] sm:$0xff]  ;;  %2441 = vmatpush3.bf16.msra.mxu0 %v3589_v47  ;;  %v3633_v2 = vpack.c.bf16 %v124_v31, %v123_v28  ;;  %v107_v1 = vld [vmem:[%s4074_s0 + $0x260] sm:$0xff]  ;;  %v125_v22 = vld [vmem:[%s4074_s0 + $0x2f0] sm:$0xff]  ;;  %3007 = vlog2.f32 %v3549_v59 }
  0x37   :  { %2473 = vmatpush3.bf16.msra.mxu1 %v3594_v48  ;;  %2443 = vmatprep.subr.bf16.mxu0 %v3596_v32  ;;  %4172 = vst [vmem:[#allocation33_spill] sm:$0xff] %v3631_v6  ;;  %v108_v57 = vld [vmem:[%s4074_s0 + $0x268] sm:$0xff]  ;;  %v139_v18 = vld [vmem:[%s4074_s0 + $0x360] sm:$0xff]  ;;  %v3645_v49 = vpack.c.bf16 %v156_v40, %v155_v33  ;;  %v126_v28 = vld [vmem:[%s4074_s0 + $0x2f8] sm:$0xff]  ;;  %3009 = vlog2.f32 %v3554_v61 }
  0x38   :  { %4173 = vst [vmem:[#allocation34_spill] sm:$0xff] %v3633_v2  ;;  %2475 = vmatprep.subr.bf16.mxu1 %v3609_v4  ;;  %v140_v58 = vld [vmem:[%s4074_s0 + $0x368] sm:$0xff]  ;;  %v157_v31 = vld [vmem:[%s4074_s0 + $0x3f0] sm:$0xff]  ;;  %v158_v33 = vld [vmem:[%s4074_s0 + $0x3f8] sm:$0xff]  ;;  %v3663_v40 = vpack.c.bf16 %v108_v57, %v107_v1  ;;  %v3669_v32 = vpack.c.bf16 %v126_v28, %v125_v22 }
  0x39   :  { %4174 = vst [vmem:[#allocation35_spill] sm:$0xff] %v3645_v49  ;;  %v3667_v4 = vpack.c.bf16 %v140_v58, %v139_v18  ;;  %v109_v48 = vld [vmem:[%s4074_s0 + $0x270] sm:$0xff]  ;;  %v110_v47 = vld [vmem:[%s4074_s0 + $0x278] sm:$0xff]  ;;  %v3678_v57 = vpack.c.bf16 %v158_v33, %v157_v31 }
  0x3a   :  { %2445 = vmatpush3.bf16.msra.mxu0 %v3627_v41  ;;  %v141_v1 = vld [vmem:[%s4074_s0 + $0x370] sm:$0xff]  ;;  %v142_v18 = vld [vmem:[%s4074_s0 + $0x378] sm:$0xff]  ;;  %v3687_v28 = vpack.c.bf16 %v110_v47, %v109_v48 }
  0x3b   :  { %2477 = vmatpush3.bf16.msra.mxu1 %v3631_v6  ;;  %2447 = vmatprep.subr.bf16.mxu0 %v3633_v2  ;;  %4175 = vst [vmem:[#allocation36_spill] sm:$0xff] %v3667_v4  ;;  %v3691_v31 = vpack.c.bf16 %v142_v18, %v141_v1  ;;  %v3698_v2 = vld [vmem:[%s4075_s1 + $0x20] sm:$0xff]  ;;  %v3705_v47 = vld [vmem:[%s4075_s1 + $0x30] sm:$0xff] }
  0x3c   :  { %2479 = vmatprep.subr.bf16.mxu1 %v3645_v49  ;;  %v3000_v58 = vpop.eup %2999  ;;  %4176 = vst [vmem:[#allocation37_spill] sm:$0xff] %v3698_v2  ;;  %4177 = vst [vmem:[#allocation38_spill] sm:$0xff] %v3705_v47  ;;  %3011 = vlog2.f32 %v3698_v2 }
  0x3d   :  { %v3002_v22 = vpop.eup %3001  ;;  %v442_v33 = vmul.f32 0.6931472, %v3000_v58  ;;  %3013 = vlog2.f32 %v3705_v47 }
  0x3e   :  { %2449 = vmatpush3.bf16.msra.mxu0 %v3663_v40  ;;  %v446_v49 = vmul.f32 0.6931472, %v3002_v22 }
  0x3f   :  { %2481 = vmatpush3.bf16.msra.mxu1 %v3667_v4  ;;  %2451 = vmatprep.subr.bf16.mxu0 %v3669_v32  ;;  %v456_v48 = vmul.f32 %v442_v33, %v3321_v23 }
  0x40   :  { %2483 = vmatprep.subr.bf16.mxu1 %v3678_v57  ;;  %v458_v1 = vmul.f32 %v446_v49, %v3326_v24  ;;  %v3004_v49 = vpop.eup %3003 }
  0x41   :  { %v3006_v18 = vpop.eup %3005  ;;  %v440_v22 = vmul.f32 0.6931472, %v3004_v49 }
  0x42   :  { %2453 = vmatpush3.bf16.msra.mxu0 %v3687_v28  ;;  %v3008_v58 = vpop.eup %3007 }
  0x43   :  { %2485 = vmatpush3.bf16.msra.mxu1 %v3691_v31  ;;  %2487 = vmatprep.subr.bf16.mxu0 %v3091_v3  ;;  %v3010_v33 = vpop.eup %3009  ;;  %v455_v24 = vmul.f32 %v440_v22, %v3424_v9  ;;  %v4182_v22 = vld [vmem:[#allocation22_spill] sm:$0xff] }
  0x44   :  { %2519 = vmatprep.subr.bf16.mxu1 %v3102_v7  ;;  %v454_v23 = vmul.f32 0.6931472, %v3010_v33  ;;  %v4183_v33 = vld [vmem:[#allocation23_spill] sm:$0xff] }
  0x45   :  { %364 = vmatmul.mubr.f32.vlgmr.msra.gmra.mrb[2].mxu0 %v3698_v2 }
  0x46   :  { %434 = vmatmul.mubr.f32.vlgmr.msra.gmra.mrb[2].mxu1 %v3705_v47  ;;  %2489 = vmatpush3.bf16.msra.mxu0 %v3104_v8  ;;  %v3012_v9 = vpop.eup %3011 }
  0x47   :  { %2521 = vmatpush3.bf16.msra.mxu1 %v3116_v12  ;;  %2491 = vmatprep.subr.bf16.mxu0 %v3129_v16 }
  0x48   :  { %2523 = vmatprep.subr.bf16.mxu1 %v3131_v17  ;;  %527 = vmatprep.mubr.f32.mxu0 %v456_v48  ;;  %v444_v48 = vmul.f32 0.6931472, %v3006_v18  ;;  %v462_v18 = vmul.f32 %v454_v23, %v3554_v61  ;;  %v4179_v23 = vld [vmem:[#allocation19_spill] sm:$0xff]  ;;  %v4188_v61 = vld [vmem:[#allocation30_spill] sm:$0xff] }
  0x49   :  { %597 = vmatprep.mubr.f32.mxu1 %v458_v1  ;;  %v450_v1 = vmul.f32 0.6931472, %v3008_v58  ;;  %v4181_v58 = vld [vmem:[#allocation21_spill] sm:$0xff] }
  0x4a   :  { %2493 = vmatpush3.bf16.msra.mxu0 %v3143_v21 }
  0x4b   :  { %2525 = vmatpush3.bf16.msra.mxu1 %v3156_v25  ;;  %2495 = vmatprep.subr.bf16.mxu0 %v3158_v26  ;;  %v460_v49 = vmul.f32 %v450_v1, %v3549_v59  ;;  %v4185_v1 = vld [vmem:[#allocation27_spill] sm:$0xff] }
  0x4c   :  { %2527 = vmatprep.subr.bf16.mxu1 %v3169_v30  ;;  %v4189_v59 = vld [vmem:[#allocation31_spill] sm:$0xff] }
  0x4e   :  { %2497 = vmatpush3.bf16.msra.mxu0 %v3181_v34 }
  0x4f   :  { %2529 = vmatpush3.bf16.msra.mxu1 %v3194_v38  ;;  %2499 = vmatprep.subr.bf16.mxu0 %v3196_v39 }
  0x50   :  { %2531 = vmatprep.subr.bf16.mxu1 %v3208_v43 }
  0x52   :  { %2501 = vmatpush3.bf16.msra.mxu0 %v3229_v50 }
  0x53   :  { %2533 = vmatpush3.bf16.msra.mxu1 %v3233_v51  ;;  %2503 = vmatprep.subr.bf16.mxu0 %v3235_v52 }
  0x54   :  { %2535 = vmatprep.subr.bf16.mxu1 %v3247_v56 }
  0x56   :  { %2505 = vmatpush3.bf16.msra.mxu0 %v3265_v62 }
  0x57   :  { %2537 = vmatpush3.bf16.msra.mxu1 %v3269_v63  ;;  %2507 = vmatprep.subr.bf16.mxu0 %v3271_v0 }
  0x58   :  { %2539 = vmatprep.subr.bf16.mxu1 %v3283_v5 }
  0x5a   :  { %2509 = vmatpush3.bf16.msra.mxu0 %v3301_v14 }
  0x5b   :  { %2541 = vmatpush3.bf16.msra.mxu1 %v3311_v19  ;;  %2511 = vmatprep.subr.bf16.mxu0 %v3313_v20 }
  0x5c   :  { %2543 = vmatprep.subr.bf16.mxu1 %v3329_v27  ;;  %v457_v27 = vmul.f32 %v444_v48, %v3429_v10  ;;  %v4184_v48 = vld [vmem:[#allocation26_spill] sm:$0xff]  ;;  %v4190_v10 = vld [vmem:[#allocation32_spill] sm:$0xff] }
  0x5e   :  { %2513 = vmatpush3.bf16.msra.mxu0 %v3349_v35 }
  0x5f   :  { %2545 = vmatpush3.bf16.msra.mxu1 %v3353_v36  ;;  %2515 = vmatprep.subr.bf16.mxu0 %v3355_v37 }
  0x60   :  { %2547 = vmatprep.subr.bf16.mxu1 %v3367_v44 }
  0x62   :  { %2517 = vmatpush3.bf16.msra.mxu0 %v3385_v53 }
  0x63   :  { %2549 = vmatpush3.bf16.msra.mxu1 %v3389_v54  ;;  %2551 = vmatprep.subr.bf16.mxu0 %v3391_v55 }
  0x64   :  { %2583 = vmatprep.subr.bf16.mxu1 %v3403_v60 }
  0x65   :  { %528 = vmatmul.mubr.f32.vlgmr.msra.gmra.mrb[4].mxu0 %v455_v24  ;;  %v4178_v24 = vld [vmem:[#allocation18_spill] sm:$0xff] }
  0x66   :  { %598 = vmatmul.mubr.f32.vlgmr.msra.gmra.mrb[4].mxu1 %v457_v27  ;;  %2553 = vmatpush3.bf16.msra.mxu0 %v3431_v11  ;;  %v4180_v27 = vld [vmem:[#allocation20_spill] sm:$0xff] }
  0x67   :  { %2585 = vmatpush3.bf16.msra.mxu1 %v3435_v13  ;;  %2555 = vmatprep.subr.bf16.mxu0 %v3437_v15 }
  0x68   :  { %2587 = vmatprep.subr.bf16.mxu1 %v3449_v29  ;;  %667 = vmatprep.mubr.f32.mxu0 %v460_v49  ;;  %v4186_v49 = vld [vmem:[#allocation28_spill] sm:$0xff] }
  0x69   :  { %737 = vmatprep.mubr.f32.mxu1 %v462_v18  ;;  %v4187_v18 = vld [vmem:[#allocation29_spill] sm:$0xff] }
  0x6a   :  { %2557 = vmatpush3.bf16.msra.mxu0 %v3469_v42 }
  0x6b   :  { %2589 = vmatpush3.bf16.msra.mxu1 %v3473_v45  ;;  %2559 = vmatprep.subr.bf16.mxu0 %v3475_v46 }
  0x6c   :  { %2591 = vmatprep.subr.bf16.mxu1 %v4178_v24 }
  0x6e   :  { %2561 = vmatpush3.bf16.msra.mxu0 %v4179_v23 }
  0x6f   :  { %2593 = vmatpush3.bf16.msra.mxu1 %v4180_v27  ;;  %2563 = vmatprep.subr.bf16.mxu0 %v4181_v58 }
  0x70   :  { %2595 = vmatprep.subr.bf16.mxu1 %v4182_v22  ;;  %v3014_v22 = vpop.eup %3013 }
  0x72   :  { %2565 = vmatpush3.bf16.msra.mxu0 %v4183_v33  ;;  %v4191_v33 = vld [vmem:[#allocation34_spill] sm:$0xff] }
  0x73   :  { %2597 = vmatpush3.bf16.msra.mxu1 %v4184_v48  ;;  %2567 = vmatprep.subr.bf16.mxu0 %v4185_v1  ;;  %v4192_v48 = vld [vmem:[#allocation35_spill] sm:$0xff]  ;;  %v448_v1 = vmul.f32 0.6931472, %v3012_v9  ;;  %v3791_v9 = vld [vmem:[%s4076_s2 + $0x8] sm:$0xff] }
  0x74   :  { %2599 = vmatprep.subr.bf16.mxu1 %v4186_v49  ;;  %3015 = vlog2.f32 %v3791_v9 }
  0x76   :  { %2569 = vmatpush3.bf16.msra.mxu0 %v4187_v18  ;;  %v452_v18 = vmul.f32 0.6931472, %v3014_v22  ;;  %v3797_v22 = vld [vmem:[%s4076_s2 + $0x18] sm:$0xff] }
  0x77   :  { %2601 = vmatpush3.bf16.msra.mxu1 %v4188_v61  ;;  %2571 = vmatprep.subr.bf16.mxu0 %v4189_v59  ;;  %3017 = vlog2.f32 %v3797_v22 }
  0x78   :  { %2603 = vmatprep.subr.bf16.mxu1 %v4190_v10  ;;  %v459_v10 = vmul.f32 %v448_v1, %v3698_v2  ;;  %v3838_v1 = vld [vmem:[%s4076_s2 + $0x10] sm:$0xff] }
  0x79   :  { %v4194_v2 = vld [vmem:[#allocation22_spill] sm:$0xff] }
  0x7a   :  { %2573 = vmatpush3.bf16.msra.mxu0 %v3627_v41 }
  0x7b   :  { %2605 = vmatpush3.bf16.msra.mxu1 %v3631_v6  ;;  %2575 = vmatprep.subr.bf16.mxu0 %v4191_v33  ;;  %v461_v6 = vmul.f32 %v452_v18, %v3705_v47  ;;  %v3846_v18 = vld [vmem:[%s4076_s2 + $0x28] sm:$0xff]  ;;  %v3853_v47 = vld [vmem:[%s4076_s2 + $0x38] sm:$0xff] }
  0x7c   :  { %2607 = vmatprep.subr.bf16.mxu1 %v4192_v48 }
  0x7e   :  { %2577 = vmatpush3.bf16.msra.mxu0 %v3663_v40 }
  0x7f   :  { %2609 = vmatpush3.bf16.msra.mxu1 %v3667_v4  ;;  %2579 = vmatprep.subr.bf16.mxu0 %v3669_v32 }
  0x80   :  { %2611 = vmatprep.subr.bf16.mxu1 %v3678_v57 }
  0x82   :  { %2581 = vmatpush3.bf16.msra.mxu0 %v3687_v28 }
  0x83   :  { %2613 = vmatpush3.bf16.msra.mxu1 %v3691_v31  ;;  %2615 = vmatprep.subr.bf16.mxu0 %v3091_v3 }
  0x84   :  { %2647 = vmatprep.subr.bf16.mxu1 %v3102_v7 }
  0x85   :  { %668 = vmatmul.mubr.f32.vlgmr.msra.gmra.mrb[6].mxu0 %v459_v10  ;;  %v4193_v10 = vld [vmem:[#allocation12_spill] sm:$0xff] }
  0x86   :  { %738 = vmatmul.mubr.f32.vlgmr.msra.gmra.mrb[6].mxu1 %v461_v6  ;;  %2617 = vmatpush3.bf16.msra.mxu0 %v3104_v8  ;;  %v3832_v6 = vld [vmem:[%s4076_s2] sm:$0xff] }
  0x87   :  { %2649 = vmatpush3.bf16.msra.mxu1 %v3116_v12  ;;  %2619 = vmatprep.subr.bf16.mxu0 %v3129_v16  ;;  %3019 = vlog2.f32 %v3832_v6 }
  0x88   :  { %2651 = vmatprep.subr.bf16.mxu1 %v3131_v17  ;;  %807 = vmatprep.mubr.f32.mxu0 %v3791_v9  ;;  %3021 = vlog2.f32 %v3838_v1 }
  0x89   :  { %877 = vmatprep.mubr.f32.mxu1 %v3797_v22  ;;  %3023 = vlog2.f32 %v3846_v18 }
  0x8a   :  { %2621 = vmatpush3.bf16.msra.mxu0 %v3143_v21  ;;  %3025 = vlog2.f32 %v3853_v47 }
  0x8b   :  { %2653 = vmatpush3.bf16.msra.mxu1 %v3156_v25  ;;  %2623 = vmatprep.subr.bf16.mxu0 %v3158_v26 }
  0x8c   :  { %2655 = vmatprep.subr.bf16.mxu1 %v3169_v30 }
  0x8e   :  { %2625 = vmatpush3.bf16.msra.mxu0 %v3181_v34 }
  0x8f   :  { %2657 = vmatpush3.bf16.msra.mxu1 %v3194_v38  ;;  %2627 = vmatprep.subr.bf16.mxu0 %v3196_v39 }
  0x90   :  { %2659 = vmatprep.subr.bf16.mxu1 %v3208_v43 }
  0x92   :  { %2629 = vmatpush3.bf16.msra.mxu0 %v3229_v50 }
  0x93   :  { %2661 = vmatpush3.bf16.msra.mxu1 %v3233_v51  ;;  %2631 = vmatprep.subr.bf16.mxu0 %v3235_v52 }
  0x94   :  { %2663 = vmatprep.subr.bf16.mxu1 %v3247_v56 }
  0x96   :  { %2633 = vmatpush3.bf16.msra.mxu0 %v3265_v62 }
  0x97   :  { %2665 = vmatpush3.bf16.msra.mxu1 %v3269_v63  ;;  %2635 = vmatprep.subr.bf16.mxu0 %v3271_v0 }
  0x98   :  { %2667 = vmatprep.subr.bf16.mxu1 %v3283_v5 }
  0x9a   :  { %2637 = vmatpush3.bf16.msra.mxu0 %v3301_v14 }
  0x9b   :  { %2669 = vmatpush3.bf16.msra.mxu1 %v3311_v19  ;;  %2639 = vmatprep.subr.bf16.mxu0 %v3313_v20 }
  0x9c   :  { %2671 = vmatprep.subr.bf16.mxu1 %v4193_v10 }
  0x9e   :  { %2641 = vmatpush3.bf16.msra.mxu0 %v3349_v35 }
  0x9f   :  { %2673 = vmatpush3.bf16.msra.mxu1 %v3353_v36  ;;  %2643 = vmatprep.subr.bf16.mxu0 %v3355_v37 }
  0xa0   :  { %2675 = vmatprep.subr.bf16.mxu1 %v3367_v44 }
  0xa2   :  { %2645 = vmatpush3.bf16.msra.mxu0 %v3385_v53 }
  0xa3   :  { %2677 = vmatpush3.bf16.msra.mxu1 %v3389_v54  ;;  %2679 = vmatprep.subr.bf16.mxu0 %v3391_v55 }
  0xa4   :  { %2711 = vmatprep.subr.bf16.mxu1 %v3403_v60 }
  0xa5   :  { %808 = vmatmul.mubr.f32.vlgmr.msra.gmra.mrb[8].mxu0 %v3832_v6 }
  0xa6   :  { %878 = vmatmul.mubr.f32.vlgmr.msra.gmra.mrb[8].mxu1 %v3838_v1  ;;  %2681 = vmatpush3.bf16.msra.mxu0 %v3431_v11 }
  0xa7   :  { %2713 = vmatpush3.bf16.msra.mxu1 %v3435_v13  ;;  %2683 = vmatprep.subr.bf16.mxu0 %v3437_v15  ;;  %v4196_v15 = vld [vmem:[#allocation26_spill] sm:$0xff] }
  0xa8   :  { %2715 = vmatprep.subr.bf16.mxu1 %v3449_v29  ;;  %947 = vmatprep.mubr.f32.mxu0 %v3846_v18  ;;  %v4195_v29 = vld [vmem:[#allocation23_spill] sm:$0xff] }
  0xa9   :  { %1017 = vmatprep.mubr.f32.mxu1 %v3853_v47 }
  0xaa   :  { %2685 = vmatpush3.bf16.msra.mxu0 %v3469_v42  ;;  %v4197_v42 = vld [vmem:[#allocation27_spill] sm:$0xff] }
  0xab   :  { %2717 = vmatpush3.bf16.msra.mxu1 %v3473_v45  ;;  %2687 = vmatprep.subr.bf16.mxu0 %v3475_v46 }
  0xac   :  { %2719 = vmatprep.subr.bf16.mxu1 %v4178_v24  ;;  %v4198_v24 = vld [vmem:[#allocation29_spill] sm:$0xff] }
  0xae   :  { %2689 = vmatpush3.bf16.msra.mxu0 %v4179_v23 }
  0xaf   :  { %2721 = vmatpush3.bf16.msra.mxu1 %v4180_v27  ;;  %2691 = vmatprep.subr.bf16.mxu0 %v4181_v58  ;;  %v4199_v58 = vld [vmem:[#allocation32_spill] sm:$0xff] }
  0xb0   :  { %2723 = vmatprep.subr.bf16.mxu1 %v4194_v2 }
  0xb2   :  { %2693 = vmatpush3.bf16.msra.mxu0 %v4195_v29  ;;  %v4200_v29 = vld [vmem:[#allocation33_spill] sm:$0xff] }
  0xb3   :  { %2725 = vmatpush3.bf16.msra.mxu1 %v4196_v15  ;;  %2695 = vmatprep.subr.bf16.mxu0 %v4197_v42  ;;  %v3016_v42 = vpop.eup %3015 }
  0xb4   :  { %2727 = vmatprep.subr.bf16.mxu1 %v4186_v49  ;;  %v3018_v15 = vpop.eup %3017 }
  0xb6   :  { %2697 = vmatpush3.bf16.msra.mxu0 %v4198_v24 }
  0xb7   :  { %2729 = vmatpush3.bf16.msra.mxu1 %v4188_v61  ;;  %2699 = vmatprep.subr.bf16.mxu0 %v4189_v59  ;;  %v1026_v59 = vmul.f32 0.6931472, %v3016_v42 }
  0xb8   :  { %2731 = vmatprep.subr.bf16.mxu1 %v4199_v58  ;;  %v1030_v58 = vmul.f32 0.6931472, %v3018_v15 }
  0xb9   :  { %v1040_v15 = vmul.f32 %v1026_v59, %v3791_v9  ;;  %v3020_v59 = vpop.eup %3019 }
  0xba   :  { %2701 = vmatpush3.bf16.msra.mxu0 %v3627_v41  ;;  %v1042_v42 = vmul.f32 %v1030_v58, %v3797_v22  ;;  %v3022_v58 = vpop.eup %3021 }
  0xbb   :  { %2733 = vmatpush3.bf16.msra.mxu1 %v4200_v29  ;;  %2703 = vmatprep.subr.bf16.mxu0 %v4191_v33  ;;  %v3890_v33 = vld [vmem:[%s4076_s2 + $0x20] sm:$0xff] }
  0xbc   :  { %2735 = vmatprep.subr.bf16.mxu1 %v4192_v48  ;;  %3027 = vlog2.f32 %v3890_v33 }
  0xbe   :  { %2705 = vmatpush3.bf16.msra.mxu0 %v3663_v40 }
  0xbf   :  { %2737 = vmatpush3.bf16.msra.mxu1 %v3667_v4  ;;  %2707 = vmatprep.subr.bf16.mxu0 %v3669_v32  ;;  %v3897_v4 = vld [vmem:[%s4076_s2 + $0x30] sm:$0xff]  ;;  %s3061_s2 = smov [#allocation2]  }
  0xc0   :  { %2739 = vmatprep.subr.bf16.mxu1 %v3678_v57  ;;  %3029 = vlog2.f32 %v3897_v4  ;;  %s1649_s28 = sshll.u32 %s3061_s2, 4  ;;  %s1650_s28 = int_to_ptr.vmem [resolvable:$true] %s1649_s28 }
  0xc1   :  { %s3037_s29 = scalar_lea.vmem %s1650_s28, 128  ;;  %p3042_p1 = scmp.lt.s32.totalorder %s1650_s28, %s1650_s28 }
  0xc2   :  { %2709 = vmatpush3.bf16.msra.mxu0 %v3687_v28  ;;  %p3038_p0 = scmp.ne.s32.totalorder %s1650_s28, %s3037_s29  ;;  %p3043_p2 = scmp.lt.s32.totalorder %s3037_s29, %s3037_s29 }
  0xc3   :  { %2741 = vmatpush3.bf16.msra.mxu1 %v3691_v31  ;;  %2743 = vmatprep.subr.bf16.mxu0 %v3091_v3 }
  0xc4   :  { %2775 = vmatprep.subr.bf16.mxu1 %v3102_v7  ;;  %p3044_p3 = por %p3043_p2, %p3042_p1 }
  0xc5   :  { %948 = vmatmul.mubr.f32.vlgmr.msra.gmra.mrb[10].mxu0 %v3890_v33 }
  0xc6   :  { %1018 = vmatmul.mubr.f32.vlgmr.msra.gmra.mrb[10].mxu1 %v3897_v4  ;;  %2745 = vmatpush3.bf16.msra.mxu0 %v3104_v8  ;;  %p3045_p4 = pnand %p3044_p3, %p3038_p0 }
  0xc7   :  { %2777 = vmatpush3.bf16.msra.mxu1 %v3116_v12  ;;  %2747 = vmatprep.subr.bf16.mxu0 %v3129_v16 }
  0xc8   :  { %2779 = vmatprep.subr.bf16.mxu1 %v3131_v17  ;;  %1111 = vmatprep.mubr.f32.mxu0 %v1040_v15  ;;  %v3024_v15 = vpop.eup %3023 }
  0xc9   :  { %1181 = vmatprep.mubr.f32.mxu1 %v1042_v42  ;;  %v1024_v42 = vmul.f32 0.6931472, %v3020_v59 }
  0xca   :  { %2749 = vmatpush3.bf16.msra.mxu0 %v3143_v21 }
  0xcb   :  { %2781 = vmatpush3.bf16.msra.mxu1 %v3156_v25  ;;  %2751 = vmatprep.subr.bf16.mxu0 %v3158_v26 }
  0xcc   :  { %2783 = vmatprep.subr.bf16.mxu1 %v3169_v30 }
  0xce   :  { %2753 = vmatpush3.bf16.msra.mxu0 %v3181_v34 }
  0xcf   :  { %2785 = vmatpush3.bf16.msra.mxu1 %v3194_v38  ;;  %2755 = vmatprep.subr.bf16.mxu0 %v3196_v39 }
  0xd0   :  { %2787 = vmatprep.subr.bf16.mxu1 %v3208_v43 }
  0xd2   :  { %2757 = vmatpush3.bf16.msra.mxu0 %v3229_v50 }
  0xd3   :  { %2789 = vmatpush3.bf16.msra.mxu1 %v3233_v51  ;;  %2759 = vmatprep.subr.bf16.mxu0 %v3235_v52 }
  0xd4   :  { %2791 = vmatprep.subr.bf16.mxu1 %v3247_v56  ;;  %v3026_v56 = vpop.eup %3025 }
  0xd6   :  { %2761 = vmatpush3.bf16.msra.mxu0 %v3265_v62 }
  0xd7   :  { %2793 = vmatpush3.bf16.msra.mxu1 %v3269_v63  ;;  %2763 = vmatprep.subr.bf16.mxu0 %v3271_v0  ;;  %v1028_v63 = vmul.f32 0.6931472, %v3022_v58 }
  0xd8   :  { %2795 = vmatprep.subr.bf16.mxu1 %v3283_v5  ;;  %v1039_v5 = vmul.f32 %v1024_v42, %v3832_v6  ;;  %v4208_v42 = vld [vmem:[#allocation27_spill] sm:$0xff] }
  0xda   :  { %2765 = vmatpush3.bf16.msra.mxu0 %v3301_v14  ;;  %v1034_v14 = vmul.f32 0.6931472, %v3024_v15  ;;  %v4202_v15 = vld [vmem:[#allocation16_spill] sm:$0xff] }
  0xdb   :  { %2797 = vmatpush3.bf16.msra.mxu1 %v3311_v19  ;;  %2767 = vmatprep.subr.bf16.mxu0 %v3313_v20  ;;  %v1038_v19 = vmul.f32 0.6931472, %v3026_v56  ;;  %v4201_v56 = vld [vmem:[#allocation15_spill] sm:$0xff] }
  0xdc   :  { %2799 = vmatprep.subr.bf16.mxu1 %v4193_v10  ;;  %v1041_v10 = vmul.f32 %v1028_v63, %v3838_v1  ;;  %v1044_v59 = vmul.f32 %v1034_v14, %v3846_v18  ;;  %v4203_v63 = vld [vmem:[#allocation17_spill] sm:$0xff] }
  0xdd   :  { %v1046_v58 = vmul.f32 %v1038_v19, %v3853_v47  ;;  %v4205_v14 = vld [vmem:[#allocation21_spill] sm:$0xff]  ;;  %v4206_v19 = vld [vmem:[#allocation23_spill] sm:$0xff] }
  0xde   :  { %2769 = vmatpush3.bf16.msra.mxu0 %v3349_v35 }
  0xdf   :  { %2801 = vmatpush3.bf16.msra.mxu1 %v3353_v36  ;;  %2771 = vmatprep.subr.bf16.mxu0 %v3355_v37 }
  0xe0   :  { %2803 = vmatprep.subr.bf16.mxu1 %v3367_v44 }
  0xe2   :  { %2773 = vmatpush3.bf16.msra.mxu0 %v3385_v53 }
  0xe3   :  { %2805 = vmatpush3.bf16.msra.mxu1 %v3389_v54  ;;  %2807 = vmatprep.subr.bf16.mxu0 %v3391_v55 }
  0xe4   :  { %2839 = vmatprep.subr.bf16.mxu1 %v3403_v60 }
  0xe5   :  { %1112 = vmatmul.mubr.f32.vlgmr.msra.gmra.mrb[12].mxu0 %v1039_v5  ;;  %v4204_v5 = vld [vmem:[#allocation18_spill] sm:$0xff] }
  0xe6   :  { %1182 = vmatmul.mubr.f32.vlgmr.msra.gmra.mrb[12].mxu1 %v1041_v10  ;;  %2809 = vmatpush3.bf16.msra.mxu0 %v3431_v11  ;;  %v4207_v10 = vld [vmem:[#allocation26_spill] sm:$0xff] }
  0xe7   :  { %2841 = vmatpush3.bf16.msra.mxu1 %v3435_v13  ;;  %2811 = vmatprep.subr.bf16.mxu0 %v4201_v56 }
  0xe8   :  { %2843 = vmatprep.subr.bf16.mxu1 %v4202_v15  ;;  %1251 = vmatprep.mubr.f32.mxu0 %v1044_v59  ;;  %v4209_v59 = vld [vmem:[#allocation31_spill] sm:$0xff] }
  0xe9   :  { %1321 = vmatprep.mubr.f32.mxu1 %v1046_v58 }
  0xea   :  { %2813 = vmatpush3.bf16.msra.mxu0 %v4203_v63 }
  0xeb   :  { %2845 = vmatpush3.bf16.msra.mxu1 %v3473_v45  ;;  %2815 = vmatprep.subr.bf16.mxu0 %v3475_v46 }
  0xec   :  { %2847 = vmatprep.subr.bf16.mxu1 %v4204_v5 }
  0xee   :  { %2817 = vmatpush3.bf16.msra.mxu0 %v4179_v23  ;;  %v3028_v23 = vpop.eup %3027 }
  0xef   :  { %2849 = vmatpush3.bf16.msra.mxu1 %v4180_v27  ;;  %2819 = vmatprep.subr.bf16.mxu0 %v4205_v14  ;;  %v4210_v14 = vld [vmem:[#allocation32_spill] sm:$0xff] }
  0xf0   :  { %2851 = vmatprep.subr.bf16.mxu1 %v4194_v2 }
  0xf2   :  { %2821 = vmatpush3.bf16.msra.mxu0 %v4206_v19 }
  0xf3   :  { %2853 = vmatpush3.bf16.msra.mxu1 %v4207_v10  ;;  %2823 = vmatprep.subr.bf16.mxu0 %v4208_v42  ;;  %v3030_v10 = vpop.eup %3029 }
  0xf4   :  { %2855 = vmatprep.subr.bf16.mxu1 %v4186_v49  ;;  %v4211_v49 = vld [vmem:[#allocation34_spill] sm:$0xff] }
  0xf6   :  { %2825 = vmatpush3.bf16.msra.mxu0 %v4198_v24  ;;  %v4212_v24 = vld [vmem:[#allocation36_spill] sm:$0xff] }
  0xf7   :  { %2857 = vmatpush3.bf16.msra.mxu1 %v4188_v61  ;;  %2827 = vmatprep.subr.bf16.mxu0 %v4209_v59  ;;  %v1032_v59 = vmul.f32 0.6931472, %v3028_v23 }
  0xf8   :  { %v1690_v58 = vpop.f32.mrb[0].mxu0  ;;  %2859 = vmatprep.subr.bf16.mxu1 %v4210_v14  ;;  %v1036_v14 = vmul.f32 0.6931472, %v3030_v10 }
  0xf9   :  { %v1725_v2 = vpop.f32.mrb[0].mxu1  ;;  %v1691_v27 = vpop.f32.mrb[1].mxu0 }
  0xfa   :  { %v1692_v5 = vadd.f32 %v1691_v27, %v1690_v58  ;;  %v1726_v19 = vpop.f32.mrb[1].mxu1  ;;  %2829 = vmatpush3.bf16.msra.mxu0 %v3627_v41  ;;  %v4213_v27 = vld [vmem:[#allocation10_spill] sm:$0xff]  ;;  %v4214_v58 = vld [vmem:[#allocation11_spill] sm:$0xff]  ;;  %v1045_v23 = vmul.f32 %v1036_v14, %v3897_v4 }
  0xfb   :  { %v1727_v42 = vadd.f32 %v1726_v19, %v1725_v2  ;;  %2861 = vmatpush3.bf16.msra.mxu1 %v4200_v29  ;;  %2831 = vmatprep.subr.bf16.mxu0 %v4211_v49  ;;  %v1328_v2 = vsub.f32 %v4213_v27, %v3791_v9  ;;  %v1043_v19 = vmul.f32 %v1032_v59, %v3890_v33  ;;  %v4238_v59 = vld [vmem:[#allocation34_spill] sm:$0xff]  ;;  %v4239_v27 = vld [vmem:[#allocation37_spill] sm:$0xff] }
  0xfc   :  { %2863 = vmatprep.subr.bf16.mxu1 %v4192_v48  ;;  %v1330_v49 = vsub.f32 %v4214_v58, %v3797_v22  ;;  %v4240_v58 = vld [vmem:[#allocation38_spill] sm:$0xff] }
  0xfd   :  { %v296_v61 = vadd.f32 %v1727_v42, %v1692_v5  ;;  %v1336_v5 = vand.u32 2147483647, %v1328_v2  ;;  %v1331_v2 = vsub.f32 %v4239_v27, %v3890_v33 }
  0xfe   :  { %2833 = vmatpush3.bf16.msra.mxu0 %v3663_v40  ;;  %v1338_v10 = vand.u32 2147483647, %v1330_v49  ;;  %v4224_v49 = vld [vmem:[#allocation25_spill] sm:$0xff] }
  0xff   :  { %2865 = vmatpush3.bf16.msra.mxu1 %v4212_v24  ;;  %2835 = vmatprep.subr.bf16.mxu0 %v3669_v32  ;;  %v1334_v9 = vsub.f32 %v4224_v49, %v3853_v47  ;;  %v4233_v47 = vld [vmem:[#allocation28_spill] sm:$0xff] }
 0x100   :  { %2867 = vmatprep.subr.bf16.mxu1 %v3678_v57 }
 0x102   :  { %2837 = vmatpush3.bf16.msra.mxu0 %v3687_v28 }
 0x103   :  { %2869 = vmatpush3.bf16.msra.mxu1 %v3691_v31  ;;  %2871 = vmatprep.subr.bf16.mxu0 %v3091_v3  ;;  %v4215_v3 = vld [vmem:[#allocation5_spill] sm:$0xff] }
 0x104   :  { %2903 = vmatprep.subr.bf16.mxu1 %v3102_v7  ;;  %v4216_v7 = vld [vmem:[#allocation6_spill] sm:$0xff] }
 0x105   :  { %1252 = vmatmul.mubr.f32.vlgmr.msra.gmra.mrb[14].mxu0 %v1043_v19 }
 0x106   :  { %1322 = vmatmul.mubr.f32.vlgmr.msra.gmra.mrb[14].mxu1 %v1045_v23  ;;  %2873 = vmatpush3.bf16.msra.mxu0 %v3104_v8  ;;  %v1333_v23 = vsub.f32 %v4240_v58, %v3897_v4 }
 0x107   :  { %2905 = vmatpush3.bf16.msra.mxu1 %v3116_v12  ;;  %2875 = vmatprep.subr.bf16.mxu0 %v3129_v16  ;;  %v4217_v12 = vld [vmem:[#allocation7_spill] sm:$0xff] }
 0x108   :  { %2907 = vmatprep.subr.bf16.mxu1 %v3131_v17  ;;  %1407 = vmatprep.mubr.f32.mxu0 %v1336_v5 }
 0x109   :  { %1477 = vmatprep.mubr.f32.mxu1 %v1338_v10 }
 0x10a   :  { %2877 = vmatpush3.bf16.msra.mxu0 %v3143_v21 }
 0x10b   :  { %2909 = vmatpush3.bf16.msra.mxu1 %v3156_v25  ;;  %2879 = vmatprep.subr.bf16.mxu0 %v3158_v26  ;;  %v4218_v25 = vld [vmem:[#allocation8_spill] sm:$0xff] }
 0x10c   :  { %2911 = vmatprep.subr.bf16.mxu1 %v3169_v30  ;;  %v4219_v30 = vld [vmem:[#allocation9_spill] sm:$0xff] }
 0x10e   :  { %2881 = vmatpush3.bf16.msra.mxu0 %v3181_v34 }
 0x10f   :  { %2913 = vmatpush3.bf16.msra.mxu1 %v3194_v38  ;;  %2883 = vmatprep.subr.bf16.mxu0 %v3196_v39  ;;  %v4220_v39 = vld [vmem:[#allocation12_spill] sm:$0xff] }
 0x110   :  { %2915 = vmatprep.subr.bf16.mxu1 %v3208_v43  ;;  %v4221_v43 = vld [vmem:[#allocation13_spill] sm:$0xff] }
 0x112   :  { %2885 = vmatpush3.bf16.msra.mxu0 %v3229_v50  ;;  %v1327_v50 = vsub.f32 %v4221_v43, %v3832_v6  ;;  %v4236_v6 = vld [vmem:[#allocation31_spill] sm:$0xff] }
 0x113   :  { %2917 = vmatpush3.bf16.msra.mxu1 %v3233_v51  ;;  %2887 = vmatprep.subr.bf16.mxu0 %v3235_v52  ;;  %v4222_v51 = vld [vmem:[#allocation14_spill] sm:$0xff] }
 0x114   :  { %2919 = vmatprep.subr.bf16.mxu1 %v4215_v3  ;;  %v1329_v52 = vsub.f32 %v4222_v51, %v3838_v1 }
 0x116   :  { %2889 = vmatpush3.bf16.msra.mxu0 %v3265_v62  ;;  %v1337_v22 = vand.u32 2147483647, %v1329_v52 }
 0x117   :  { %2921 = vmatpush3.bf16.msra.mxu1 %v4216_v7  ;;  %2891 = vmatprep.subr.bf16.mxu0 %v3271_v0  ;;  %v4223_v0 = vld [vmem:[#allocation24_spill] sm:$0xff] }
 0x118   :  { %v1760_v8 = vpop.f32.mrb[2].mxu0  ;;  %2923 = vmatprep.subr.bf16.mxu1 %v4217_v12 }
 0x119   :  { %v1761_v16 = vpop.f32.mrb[3].mxu0  ;;  %v1795_v17 = vpop.f32.mrb[2].mxu1 }
 0x11a   :  { %v1762_v21 = vadd.f32 %v1761_v16, %v1760_v8  ;;  %2893 = vmatpush3.bf16.msra.mxu0 %v4218_v25  ;;  %v1796_v26 = vpop.f32.mrb[3].mxu1 }
 0x11b   :  { %2925 = vmatpush3.bf16.msra.mxu1 %v4219_v30  ;;  %v1797_v34 = vadd.f32 %v1796_v26, %v1795_v17  ;;  %2895 = vmatprep.subr.bf16.mxu0 %v3313_v20  ;;  %v1332_v20 = vsub.f32 %v4223_v0, %v3846_v18  ;;  %v4237_v18 = vld [vmem:[#allocation32_spill] sm:$0xff] }
 0x11c   :  { %v366_v38 = vadd.f32 %v1762_v21, %v296_v61  ;;  %2927 = vmatprep.subr.bf16.mxu1 %v4220_v39  ;;  %v1335_v61 = vand.u32 2147483647, %v1327_v50 }
 0x11e   :  { %v4012_v62 = vadd.f32 %v1797_v34, %v366_v38  ;;  %2897 = vmatpush3.bf16.msra.mxu0 %v3349_v35  ;;  %v1340_v35 = vand.u32 2147483647, %v1332_v20 }
 0x11f   :  { %2929 = vmatpush3.bf16.msra.mxu1 %v3353_v36  ;;  %2899 = vmatprep.subr.bf16.mxu0 %v3355_v37  ;;  %v1342_v36 = vand.u32 2147483647, %v1334_v9  ;;  %v4225_v37 = vld [vmem:[#allocation18_spill] sm:$0xff] }
 0x120   :  { %2931 = vmatprep.subr.bf16.mxu1 %v3367_v44  ;;  %v4226_v44 = vld [vmem:[#allocation19_spill] sm:$0xff] }
 0x122   :  { %2901 = vmatpush3.bf16.msra.mxu0 %v3385_v53  ;;  %v4227_v53 = vld [vmem:[#allocation20_spill] sm:$0xff] }
 0x123   :  { %2933 = vmatpush3.bf16.msra.mxu1 %v3389_v54  ;;  %2935 = vmatprep.subr.bf16.mxu0 %v3391_v55  ;;  %v4228_v54 = vld [vmem:[#allocation21_spill] sm:$0xff]  ;;  %v4229_v55 = vld [vmem:[#allocation22_spill] sm:$0xff] }
 0x124   :  { %2967 = vmatprep.subr.bf16.mxu1 %v3403_v60  ;;  %v4230_v60 = vld [vmem:[#allocation23_spill] sm:$0xff] }
 0x125   :  { %1408 = vmatmul.mubr.f32.vlgmr.msra.gmra.mrb[16].mxu0 %v1335_v61 }
 0x126   :  { %1478 = vmatmul.mubr.f32.vlgmr.msra.gmra.mrb[16].mxu1 %v1337_v22  ;;  %2937 = vmatpush3.bf16.msra.mxu0 %v3431_v11  ;;  %v4231_v11 = vld [vmem:[#allocation26_spill] sm:$0xff] }
 0x127   :  { %2969 = vmatpush3.bf16.msra.mxu1 %v3435_v13  ;;  %2939 = vmatprep.subr.bf16.mxu0 %v4201_v56  ;;  %v4232_v13 = vld [vmem:[#allocation27_spill] sm:$0xff] }
 0x128   :  { %2971 = vmatprep.subr.bf16.mxu1 %v4202_v15  ;;  %1547 = vmatprep.mubr.f32.mxu0 %v1340_v35 }
 0x129   :  { %1617 = vmatprep.mubr.f32.mxu1 %v1342_v36 }
 0x12a   :  { %2941 = vmatpush3.bf16.msra.mxu0 %v4203_v63 }
 0x12b   :  { %2973 = vmatpush3.bf16.msra.mxu1 %v3473_v45  ;;  %2943 = vmatprep.subr.bf16.mxu0 %v3475_v46  ;;  %v4234_v45 = vld [vmem:[#allocation29_spill] sm:$0xff]  ;;  %v4235_v46 = vld [vmem:[#allocation30_spill] sm:$0xff] }
 0x12c   :  { %2975 = vmatprep.subr.bf16.mxu1 %v4225_v37 }
 0x12e   :  { %2945 = vmatpush3.bf16.msra.mxu0 %v4226_v44 }
 0x12f   :  { %2977 = vmatpush3.bf16.msra.mxu1 %v4227_v53  ;;  %2947 = vmatprep.subr.bf16.mxu0 %v4228_v54 }
 0x130   :  { %2979 = vmatprep.subr.bf16.mxu1 %v4229_v55 }
 0x132   :  { %2949 = vmatpush3.bf16.msra.mxu0 %v4230_v60 }
 0x133   :  { %2981 = vmatpush3.bf16.msra.mxu1 %v4231_v11  ;;  %2951 = vmatprep.subr.bf16.mxu0 %v4232_v13 }
 0x134   :  { %2983 = vmatprep.subr.bf16.mxu1 %v4233_v47 }
 0x136   :  { %2953 = vmatpush3.bf16.msra.mxu0 %v4234_v45 }
 0x137   :  { %2985 = vmatpush3.bf16.msra.mxu1 %v4235_v46  ;;  %2955 = vmatprep.subr.bf16.mxu0 %v4236_v6 }
 0x138   :  { %v1830_v1 = vpop.f32.mrb[4].mxu0  ;;  %2987 = vmatprep.subr.bf16.mxu1 %v4237_v18 }
 0x139   :  { %v1865_v56 = vpop.f32.mrb[4].mxu1  ;;  %v1831_v15 = vpop.f32.mrb[5].mxu0 }
 0x13a   :  { %v1832_v63 = vadd.f32 %v1831_v15, %v1830_v1  ;;  %v1866_v14 = vpop.f32.mrb[5].mxu1  ;;  %2957 = vmatpush3.bf16.msra.mxu0 %v3627_v41  ;;  %v1341_v41 = vand.u32 2147483647, %v1333_v23 }
 0x13b   :  { %v1867_v42 = vadd.f32 %v1866_v14, %v1865_v56  ;;  %2989 = vmatpush3.bf16.msra.mxu1 %v4200_v29  ;;  %2959 = vmatprep.subr.bf16.mxu0 %v4238_v59  ;;  %v1339_v29 = vand.u32 2147483647, %v1331_v2 }
 0x13c   :  { %2991 = vmatprep.subr.bf16.mxu1 %v4192_v48 }
 0x13d   :  { %v600_v19 = vadd.f32 %v1867_v42, %v1832_v63 }
 0x13e   :  { %2961 = vmatpush3.bf16.msra.mxu0 %v3663_v40 }
 0x13f   :  { %2993 = vmatpush3.bf16.msra.mxu1 %v4212_v24  ;;  %2963 = vmatprep.subr.bf16.mxu0 %v3669_v32 }
 0x140   :  { %2995 = vmatprep.subr.bf16.mxu1 %v3678_v57 }
 0x142   :  { %2965 = vmatpush3.bf16.msra.mxu0 %v3687_v28 }
 0x143   :  { %2997 = vmatpush3.bf16.msra.mxu1 %v3691_v31 }
 0x145   :  { %1548 = vmatmul.mubr.f32.vlgmr.msra.gmra.mrb[18].mxu0 %v1339_v29 }
 0x146   :  { %1618 = vmatmul.mubr.f32.vlgmr.msra.gmra.mrb[18].mxu1 %v1341_v41 }
 0x158   :  { %v1900_v33 = vpop.f32.mrb[6].mxu0 }
 0x159   :  { %v1901_v48 = vpop.f32.mrb[7].mxu0  ;;  %v1935_v5 = vpop.f32.mrb[6].mxu1 }
 0x15a   :  { %v1902_v4 = vadd.f32 %v1901_v48, %v1900_v33  ;;  %v1936_v10 = vpop.f32.mrb[7].mxu1 }
 0x15b   :  { %v1937_v40 = vadd.f32 %v1936_v10, %v1935_v5 }
 0x15c   :  { %v670_v3 = vadd.f32 %v1902_v4, %v600_v19 }
 0x15e   :  { %v740_v24 = vadd.f32 %v1937_v40, %v670_v3 }
 0x178   :  { %v1970_v7 = vpop.f32.mrb[8].mxu0 }
 0x179   :  { %v2005_v32 = vpop.f32.mrb[8].mxu1  ;;  %v1971_v8 = vpop.f32.mrb[9].mxu0 }
 0x17a   :  { %v1972_v57 = vadd.f32 %v1971_v8, %v1970_v7  ;;  %v2006_v12 = vpop.f32.mrb[9].mxu1 }
 0x17b   :  { %v2007_v16 = vadd.f32 %v2006_v12, %v2005_v32 }
 0x17d   :  { %v880_v28 = vadd.f32 %v2007_v16, %v1972_v57 }
 0x198   :  { %v2040_v17 = vpop.f32.mrb[10].mxu0 }
 0x199   :  { %v2041_v21 = vpop.f32.mrb[11].mxu0  ;;  %v2075_v31 = vpop.f32.mrb[10].mxu1 }
 0x19a   :  { %v2042_v25 = vadd.f32 %v2041_v21, %v2040_v17  ;;  %v2076_v26 = vpop.f32.mrb[11].mxu1 }
 0x19b   :  { %v2077_v30 = vadd.f32 %v2076_v26, %v2075_v31 }
 0x19c   :  { %v950_v34 = vadd.f32 %v2042_v25, %v880_v28 }
 0x19e   :  { %v1020_v38 = vadd.f32 %v2077_v30, %v950_v34 }
 0x1a0   :  { %v1623_v39 = vmul.f32 %v1020_v38, %v4012_v62  ;;  %v1624_v43 = vmul.f32 %v1020_v38, %v740_v24 }
 0x1a2   :  { %3031 = vlog2.f32 %v1623_v39 }
 0x1a3   :  { %3033 = vrcp.f32 %v1623_v39 }
 0x1ac   :  { %v3032_v60 = vpop.eup %3031 }
 0x1ad   :  { %v3034_v13 = vpop.eup %3033  ;;  %v1628_v47 = vmul.f32 0.6931472, %v3032_v60 }
 0x1b8   :  { %v2110_v50 = vpop.f32.mrb[12].mxu0 }
 0x1b9   :  { %v2145_v51 = vpop.f32.mrb[12].mxu1  ;;  %v2111_v52 = vpop.f32.mrb[13].mxu0 }
 0x1ba   :  { %v2112_v0 = vadd.f32 %v2111_v52, %v2110_v50  ;;  %v2146_v20 = vpop.f32.mrb[13].mxu1 }
 0x1bb   :  { %v2147_v61 = vadd.f32 %v2146_v20, %v2145_v51 }
 0x1bd   :  { %v1184_v49 = vadd.f32 %v2147_v61, %v2112_v0 }
 0x1d8   :  { %v2180_v9 = vpop.f32.mrb[14].mxu0 }
 0x1d9   :  { %v2181_v22 = vpop.f32.mrb[15].mxu0  ;;  %v2215_v35 = vpop.f32.mrb[14].mxu1 }
 0x1da   :  { %v2182_v36 = vadd.f32 %v2181_v22, %v2180_v9  ;;  %v2216_v37 = vpop.f32.mrb[15].mxu1 }
 0x1db   :  { %v2217_v44 = vadd.f32 %v2216_v37, %v2215_v35 }
 0x1dc   :  { %v1254_v53 = vadd.f32 %v2182_v36, %v1184_v49 }
 0x1de   :  { %v1324_v54 = vadd.f32 %v2217_v44, %v1254_v53 }
 0x1e0   :  { %v1625_v55 = vmul.f32 %v1324_v54, %v4012_v62 }
 0x1e2   :  { %v1626_v11 = vadd.f32 %v1625_v55, %v1624_v43 }
 0x1e4   :  { %v1630_v45 = vmul.f32 %v3034_v13, %v1626_v11 }
 0x1e6   :  { %v1631_v46 = vsub.f32 %v1628_v47, %v1630_v45 }
 0x1e8   :  { %v1632_v42 = vmul.f32 0.7213475, %v1631_v46 }
 0x1ea   :  { %v1657_v59 = vadd.f32 -0.1, %v1632_v42 }
 0x1ec   :  { %v1636_v27 = vmul.f32 0.5, %v1657_v59 }
 0x1ee   :  { %3035 = vtanh.f32 %v1636_v27 }
 0x1f8   :  { %v2250_v6 = vpop.f32.mrb[16].mxu0  ;;  %v3036_v29 = vpop.eup %3035 }
 0x1f9   :  { %v2285_v1 = vpop.f32.mrb[16].mxu1  ;;  %v2251_v18 = vpop.f32.mrb[17].mxu0  ;;  %v1638_v5 = vadd.f32 1.0, %v3036_v29 }
 0x1fa   :  { %v2252_v56 = vadd.f32 %v2251_v18, %v2250_v6  ;;  %v2286_v15 = vpop.f32.mrb[17].mxu1 }
 0x1fb   :  { %v2287_v63 = vadd.f32 %v2286_v15, %v2285_v1  ;;  %v1639_v40 = vmul.f32 0.00390625, %v1638_v5 }
 0x1fd   :  { %v1480_v14 = vadd.f32 %v2287_v63, %v2252_v56 }
 0x218   :  { %v2320_v2 = vpop.f32.mrb[18].mxu0 }
 0x219   :  { %v2321_v19 = vpop.f32.mrb[19].mxu0  ;;  %v2355_v62 = vpop.f32.mrb[18].mxu1 }
 0x21a   :  { %v2322_v58 = vadd.f32 %v2321_v19, %v2320_v2  ;;  %v2356_v23 = vpop.f32.mrb[19].mxu1 }
 0x21b   :  { %v2357_v41 = vadd.f32 %v2356_v23, %v2355_v62 }
 0x21c   :  { %v1550_v33 = vadd.f32 %v2322_v58, %v1480_v14 }
 0x21e   :  { %v1620_v48 = vadd.f32 %v2357_v41, %v1550_v33 }
 0x220   :  { %v1633_v4 = vmul.f32 0.03125, %v1620_v48 }
 0x222   :  { %v1634_v10 = vsub.f32 1.0, %v1633_v4 }
 0x224   :  { %v1640_v3 = vmul.f32 %v1639_v40, %v1634_v10 }
 0x226   :  { %1642 = vst.msk [vmem:[#allocation2] sm:$0xff] %vm1641_vm0, %v1640_v3 }
 0x227   :  { %3048 = shalt.err (!%p3045_p4)
}
 0x228   :  { %s3049_s5 = scalar_lea.hbm %s4077_s3, 128 }
 0x229   :  { %p3050_p5 = scmp.ne.s32.totalorder %s4077_s3, %s3049_s5  ;;  %p3053_p6 = scmp.lt.u32.totalorder %s3049_s5, %s4077_s3 }
 0x22b   :  { %p3055_p7 = pnand %p3053_p6, %p3050_p5 }
 0x22d   :  { %3058 = shalt.err (!%p3055_p7)
}
 0x22e   :  { %1652 = dma.vmem_to_hbm [thread:$0]  %s1650_s28, 128, %s4077_s3, [#allocation3]  }
 0x22f   :  { %3059 = dma.done.wait [#allocation3], 128  }
 0x230   :  { %3060 = vsyncadd [#allocation3], 4294967168 }
 0x231   :  { %1656 = vsyncpa [#allocation3], 1 }

</bundles_post_ra>
